<compile_context>
chip_gen: v6e
topology: v6e:2x2x1
jax: 0.10.0
libtpu: 0.0.40
codegen_flags: <defaults>
</compile_context>

<pallas_src>
import jax
import jax.numpy as jnp
from jax.experimental import pallas as pl
from jax.experimental.pallas import tpu as pltpu
import numpy as np


def _identity_copy_kernel(x_ref, o_ref):
    # Pure pass-through of the current tile.
    o_ref[...] = x_ref[...]


def _sublane_pack(dtype) -> int:
    # Sublane packing requirement for the second-to-last block dim.
    itemsize = jnp.dtype(dtype).itemsize
    return {1: 32, 2: 16, 4: 8}.get(itemsize, 8)


def _choose_lane_width(padded_total: int) -> int:
    # Widest lane-dense last dim that evenly tiles the (128-padded) flat array.
    for lane in (32768, 16384, 8192, 4096, 2048, 1024, 512, 256, 128):
        if padded_total % lane == 0:
            return lane
    return 128  # unreachable: padded_total is always a multiple of 128


def _chip_tile_params() -> tuple[int, int]:
    """(tile_target_bytes, vmem_limit_bytes) chosen per TPU generation."""
    try:
        vmem = int(getattr(pltpu.get_tpu_info(), "vmem_capacity_bytes", 128 << 20))
    except Exception:
        vmem = 128 << 20
    if vmem <= (64 << 20):
        # v7x: 64 MiB physical VMEM per TensorCore. 4 MiB tiles => ~16 MiB
        # double-buffered in+out demand, inside the 32 MiB scoped limit.
        return 4 << 20, 32 << 20
    # v5e / v6e: 128 MiB physical. 8 MiB tiles amortize the ~0.35 us/step
    # pipeline overhead; explicit 64 MiB limit avoids the 16/32 MiB default.
    return 8 << 20, 64 << 20


def _row_axis_semantics(num_blocks: int):
    kind = ""
    try:
        kind = jax.devices()[0].device_kind.lower()
    except Exception:
        pass
    if "7" in kind and num_blocks >= 2:
        # v7x has 2 TensorCores per chip: CORE_PARALLEL actually splits the
        # row grid across both cores so each drives HBM.
        return (pltpu.CORE_PARALLEL,)
    return ("parallel",)


@jax.jit
def _identity_pallas(x: jax.Array) -> jax.Array:
    orig_shape = x.shape
    total = x.size
    itemsize = jnp.dtype(x.dtype).itemsize
    pack = _sublane_pack(x.dtype)

    # Flatten and pad to a multiple of 128 so the last dim is always
    # lane-dense (no masked partial stores).
    flat = x.reshape(-1)
    padded_total = ((total + 127) // 128) * 128
    pad = padded_total - total
    if pad:
        flat = jnp.pad(flat, (0, pad))

    lane = _choose_lane_width(padded_total)
    rows = padded_total // lane
    x2d = flat.reshape(rows, lane)

    tile_target, vmem_limit = _chip_tile_params()
    budget_rows = max(pack, (tile_target // (lane * itemsize)) // pack * pack)
    # Either a multiple of `pack`, or the full row extent.
    tile_r = rows if rows <= budget_rows else budget_rows

    num_blocks = pl.cdiv(rows, tile_r)

    out2d = pl.pallas_call(
        _identity_copy_kernel,
        out_shape=jax.ShapeDtypeStruct((rows, lane), x.dtype),
        grid=(num_blocks,),
        in_specs=[pl.BlockSpec((tile_r, lane), lambda i: (i, 0))],
        out_specs=pl.BlockSpec((tile_r, lane), lambda i: (i, 0)),
        compiler_params=pltpu.CompilerParams(
            dimension_semantics=_row_axis_semantics(num_blocks),
            vmem_limit_bytes=vmem_limit,
        ),
        # Pure memory traffic: read + write of the whole array.
        cost_estimate=pl.CostEstimate(
            flops=0,
            transcendentals=0,
            bytes_accessed=2 * padded_total * itemsize,
        ),
    )(x2d)

    out_flat = out2d.reshape(-1)
    if pad:
        out_flat = out_flat[:total]
    return out_flat.reshape(orig_shape)


# Below this many bytes the kernel launch overhead dominates: identity
# semantics means we simply return x.
_SMALL_BYTES = 1 << 20


def print_layer(x: jax.Array) -> jax.Array:
    """Pallas equivalent of PrintLayer.forward: print shape, return x."""
    # Mirrors `print(x.size())`.  Shapes are static in JAX, so under jax.jit
    # this fires once per trace, not once per call.
    # TODO(synk): per-invocation runtime printing of a (static) shape has no
    # clean Pallas equivalent; jax.debug.print outside the kernel would add
    # per-call overhead for no information gain.
    print(f"torch.Size({list(x.shape)})")

    itemsize = jnp.dtype(x.dtype).itemsize
    # Fast path: identity op.  Skip the kernel for degenerate inputs, small
    # arrays (launch overhead >> HBM transfer), and 64-bit dtypes that TPU
    # vregs do not natively support.
    if (
        x.ndim == 0
        or x.size == 0
        or itemsize == 8
        or x.size * itemsize < _SMALL_BYTES
    ):
        return x

    return _identity_pallas(x)


if __name__ == "__main__":
    key = jax.random.PRNGKey(0)

    # 1) Small NCHW input consistent with a conv-style network (fast path:
    #    identity elision, no kernel launch).
    k1, k2 = jax.random.split(key)
    x_small = jax.random.normal(k1, (2, 4, 16, 16), dtype=jnp.float32)
    x_small_host = np.asarray(jax.device_get(x_small))

    y_small = jax.block_until_ready(print_layer(x_small))
    assert y_small.shape == x_small_host.shape
    assert y_small.dtype == x_small.dtype
    assert np.array_equal(np.asarray(jax.device_get(y_small)), x_small_host)

    # 2) A larger (still modest, ~1 MiB) input that exercises the Pallas copy
    #    kernel path, including the pad-to-128 + slice handling.
    x_big = jax.random.normal(k2, (2, 4, 257, 129), dtype=jnp.float32)
    x_big_host = np.asarray(jax.device_get(x_big))

    y_big = jax.block_until_ready(print_layer(x_big))
    assert y_big.shape == x_big_host.shape
    assert y_big.dtype == x_big.dtype
    assert np.array_equal(np.asarray(jax.device_get(y_big)), x_big_host)

    print("KERNEL_OK")
</pallas_src>

<mosaic_0001>
module attributes {stable_mosaic.version = 11 : i64} {
  func.func @_identity_copy_kernel(%arg0: i32, %arg1: memref<2073x128xf32, #tpu.memory_space<vmem>>, %arg2: memref<2073x128xf32, #tpu.memory_space<vmem>>) attributes {dimension_semantics = [#tpu.dimension_semantics<parallel>], iteration_bounds = array<i64: 1>, scalar_prefetch = 0 : i64, scratch_operands = 0 : i64, tpu.core_type = #tpu.core_type<tc>, window_params = [{transform_indices = @transform_0, window_bounds = array<i64: 2073, 128>}, {transform_indices = @transform_1, window_bounds = array<i64: 2073, 128>}]} {
    %c0 = arith.constant 0 : index
    %c0_0 = arith.constant 0 : index
    %0 = vector.load %arg1[%c0, %c0_0] : memref<2073x128xf32, #tpu.memory_space<vmem>>, vector<2073x128xf32>
    %c0_1 = arith.constant 0 : index
    %c0_2 = arith.constant 0 : index
    %1 = vector.load %arg2[%c0_1, %c0_2] : memref<2073x128xf32, #tpu.memory_space<vmem>>, vector<2073x128xf32>
    tpu.vector_store %arg2[%c0_1, %c0_2], %0 {strides = array<i32>} : memref<2073x128xf32, #tpu.memory_space<vmem>>, vector<2073x128xf32>,
    return
  }
  func.func @transform_0(%arg0: i32) -> (i32, i32) {
    %c0_i32 = arith.constant 0 : i32
    %c0_i32_0 = arith.constant 0 : i32
    return %arg0, %c0_i32 : i32, i32
  }
  func.func @transform_1(%arg0: i32) -> (i32, i32) {
    %c0_i32 = arith.constant 0 : i32
    %c0_i32_0 = arith.constant 0 : i32
    return %arg0, %c0_i32 : i32, i32
  }
}

</mosaic_0001>

<bundles_post_ra>
// kernel: _identity_pallas.1
= control target key start
LH: loop header
LB: loop body
LE: loop exit
PB: predicated region body
PF: predicated region fallthrough
CT: control target
= control target key end

     0   :  { %s2102_s0 = inlined_call_operand.vmem [shape: f32[2073,128], index: 0, kind: input, shape index: {}]   ;;  %s2103_s1 = inlined_call_operand.vmem [shape: f32[2073,128], index: 1, kind: output, shape index: {}]  }
   0x1   :  { %v8_v0 = vld [vmem:[%s2102_s0] sm:$0xff]  ;;  %v9_v1 = vld [vmem:[%s2102_s0 + $0x8] sm:$0xff]  ;;  %v10_v2 = vld [vmem:[%s2102_s0 + $0x10] sm:$0xff] }
   0x2   :  { %268 = vst [vmem:[%s2103_s1] sm:$0xff] %v8_v0  ;;  %269 = vst [vmem:[%s2103_s1 + $0x8] sm:$0xff] %v9_v1  ;;  %v11_v3 = vld [vmem:[%s2102_s0 + $0x18] sm:$0xff]  ;;  %v12_v4 = vld [vmem:[%s2102_s0 + $0x20] sm:$0xff] }
   0x3   :  { %270 = vst [vmem:[%s2103_s1 + $0x10] sm:$0xff] %v10_v2  ;;  %v13_v5 = vld [vmem:[%s2102_s0 + $0x28] sm:$0xff]  ;;  %271 = vst [vmem:[%s2103_s1 + $0x18] sm:$0xff] %v11_v3  ;;  %v14_v6 = vld [vmem:[%s2102_s0 + $0x30] sm:$0xff] }
   0x4   :  { %272 = vst [vmem:[%s2103_s1 + $0x20] sm:$0xff] %v12_v4  ;;  %273 = vst [vmem:[%s2103_s1 + $0x28] sm:$0xff] %v13_v5  ;;  %v15_v7 = vld [vmem:[%s2102_s0 + $0x38] sm:$0xff]  ;;  %v16_v8 = vld [vmem:[%s2102_s0 + $0x40] sm:$0xff] }
   0x5   :  { %274 = vst [vmem:[%s2103_s1 + $0x30] sm:$0xff] %v14_v6  ;;  %275 = vst [vmem:[%s2103_s1 + $0x38] sm:$0xff] %v15_v7  ;;  %v17_v9 = vld [vmem:[%s2102_s0 + $0x48] sm:$0xff]  ;;  %v18_v10 = vld [vmem:[%s2102_s0 + $0x50] sm:$0xff] }
   0x6   :  { %276 = vst [vmem:[%s2103_s1 + $0x40] sm:$0xff] %v16_v8  ;;  %v19_v11 = vld [vmem:[%s2102_s0 + $0x58] sm:$0xff]  ;;  %277 = vst [vmem:[%s2103_s1 + $0x48] sm:$0xff] %v17_v9  ;;  %v20_v12 = vld [vmem:[%s2102_s0 + $0x60] sm:$0xff] }
   0x7   :  { %278 = vst [vmem:[%s2103_s1 + $0x50] sm:$0xff] %v18_v10  ;;  %279 = vst [vmem:[%s2103_s1 + $0x58] sm:$0xff] %v19_v11  ;;  %v21_v13 = vld [vmem:[%s2102_s0 + $0x68] sm:$0xff]  ;;  %v22_v14 = vld [vmem:[%s2102_s0 + $0x70] sm:$0xff] }
   0x8   :  { %280 = vst [vmem:[%s2103_s1 + $0x60] sm:$0xff] %v20_v12  ;;  %281 = vst [vmem:[%s2103_s1 + $0x68] sm:$0xff] %v21_v13  ;;  %v23_v15 = vld [vmem:[%s2102_s0 + $0x78] sm:$0xff]  ;;  %v24_v16 = vld [vmem:[%s2102_s0 + $0x80] sm:$0xff] }
   0x9   :  { %282 = vst [vmem:[%s2103_s1 + $0x70] sm:$0xff] %v22_v14  ;;  %v25_v17 = vld [vmem:[%s2102_s0 + $0x88] sm:$0xff]  ;;  %283 = vst [vmem:[%s2103_s1 + $0x78] sm:$0xff] %v23_v15  ;;  %v26_v18 = vld [vmem:[%s2102_s0 + $0x90] sm:$0xff] }
   0xa   :  { %284 = vst [vmem:[%s2103_s1 + $0x80] sm:$0xff] %v24_v16  ;;  %285 = vst [vmem:[%s2103_s1 + $0x88] sm:$0xff] %v25_v17  ;;  %v27_v19 = vld [vmem:[%s2102_s0 + $0x98] sm:$0xff]  ;;  %v28_v20 = vld [vmem:[%s2102_s0 + $0xa0] sm:$0xff] }
   0xb   :  { %286 = vst [vmem:[%s2103_s1 + $0x90] sm:$0xff] %v26_v18  ;;  %287 = vst [vmem:[%s2103_s1 + $0x98] sm:$0xff] %v27_v19  ;;  %v29_v21 = vld [vmem:[%s2102_s0 + $0xa8] sm:$0xff]  ;;  %v30_v22 = vld [vmem:[%s2102_s0 + $0xb0] sm:$0xff] }
   0xc   :  { %288 = vst [vmem:[%s2103_s1 + $0xa0] sm:$0xff] %v28_v20  ;;  %v31_v23 = vld [vmem:[%s2102_s0 + $0xb8] sm:$0xff]  ;;  %289 = vst [vmem:[%s2103_s1 + $0xa8] sm:$0xff] %v29_v21  ;;  %v32_v24 = vld [vmem:[%s2102_s0 + $0xc0] sm:$0xff] }
   0xd   :  { %290 = vst [vmem:[%s2103_s1 + $0xb0] sm:$0xff] %v30_v22  ;;  %291 = vst [vmem:[%s2103_s1 + $0xb8] sm:$0xff] %v31_v23  ;;  %v33_v25 = vld [vmem:[%s2102_s0 + $0xc8] sm:$0xff]  ;;  %v34_v26 = vld [vmem:[%s2102_s0 + $0xd0] sm:$0xff] }
   0xe   :  { %292 = vst [vmem:[%s2103_s1 + $0xc0] sm:$0xff] %v32_v24  ;;  %293 = vst [vmem:[%s2103_s1 + $0xc8] sm:$0xff] %v33_v25  ;;  %v35_v27 = vld [vmem:[%s2102_s0 + $0xd8] sm:$0xff]  ;;  %v36_v28 = vld [vmem:[%s2102_s0 + $0xe0] sm:$0xff] }
   0xf   :  { %294 = vst [vmem:[%s2103_s1 + $0xd0] sm:$0xff] %v34_v26  ;;  %v37_v29 = vld [vmem:[%s2102_s0 + $0xe8] sm:$0xff]  ;;  %295 = vst [vmem:[%s2103_s1 + $0xd8] sm:$0xff] %v35_v27  ;;  %v38_v30 = vld [vmem:[%s2102_s0 + $0xf0] sm:$0xff] }
  0x10   :  { %296 = vst [vmem:[%s2103_s1 + $0xe0] sm:$0xff] %v36_v28  ;;  %297 = vst [vmem:[%s2103_s1 + $0xe8] sm:$0xff] %v37_v29  ;;  %v39_v31 = vld [vmem:[%s2102_s0 + $0xf8] sm:$0xff]  ;;  %v40_v32 = vld [vmem:[%s2102_s0 + $0x100] sm:$0xff] }
  0x11   :  { %298 = vst [vmem:[%s2103_s1 + $0xf0] sm:$0xff] %v38_v30  ;;  %299 = vst [vmem:[%s2103_s1 + $0xf8] sm:$0xff] %v39_v31  ;;  %v41_v33 = vld [vmem:[%s2102_s0 + $0x108] sm:$0xff]  ;;  %v42_v34 = vld [vmem:[%s2102_s0 + $0x110] sm:$0xff] }
  0x12   :  { %300 = vst [vmem:[%s2103_s1 + $0x100] sm:$0xff] %v40_v32  ;;  %v43_v35 = vld [vmem:[%s2102_s0 + $0x118] sm:$0xff]  ;;  %301 = vst [vmem:[%s2103_s1 + $0x108] sm:$0xff] %v41_v33  ;;  %v44_v36 = vld [vmem:[%s2102_s0 + $0x120] sm:$0xff] }
  0x13   :  { %302 = vst [vmem:[%s2103_s1 + $0x110] sm:$0xff] %v42_v34  ;;  %303 = vst [vmem:[%s2103_s1 + $0x118] sm:$0xff] %v43_v35  ;;  %v45_v37 = vld [vmem:[%s2102_s0 + $0x128] sm:$0xff]  ;;  %v46_v38 = vld [vmem:[%s2102_s0 + $0x130] sm:$0xff] }
  0x14   :  { %304 = vst [vmem:[%s2103_s1 + $0x120] sm:$0xff] %v44_v36  ;;  %305 = vst [vmem:[%s2103_s1 + $0x128] sm:$0xff] %v45_v37  ;;  %v47_v39 = vld [vmem:[%s2102_s0 + $0x138] sm:$0xff]  ;;  %v48_v40 = vld [vmem:[%s2102_s0 + $0x140] sm:$0xff] }
  0x15   :  { %306 = vst [vmem:[%s2103_s1 + $0x130] sm:$0xff] %v46_v38  ;;  %v49_v41 = vld [vmem:[%s2102_s0 + $0x148] sm:$0xff]  ;;  %307 = vst [vmem:[%s2103_s1 + $0x138] sm:$0xff] %v47_v39  ;;  %v50_v42 = vld [vmem:[%s2102_s0 + $0x150] sm:$0xff] }
  0x16   :  { %308 = vst [vmem:[%s2103_s1 + $0x140] sm:$0xff] %v48_v40  ;;  %309 = vst [vmem:[%s2103_s1 + $0x148] sm:$0xff] %v49_v41  ;;  %v51_v43 = vld [vmem:[%s2102_s0 + $0x158] sm:$0xff]  ;;  %v52_v44 = vld [vmem:[%s2102_s0 + $0x160] sm:$0xff] }
  0x17   :  { %310 = vst [vmem:[%s2103_s1 + $0x150] sm:$0xff] %v50_v42  ;;  %311 = vst [vmem:[%s2103_s1 + $0x158] sm:$0xff] %v51_v43  ;;  %v53_v45 = vld [vmem:[%s2102_s0 + $0x168] sm:$0xff]  ;;  %v54_v46 = vld [vmem:[%s2102_s0 + $0x170] sm:$0xff] }
  0x18   :  { %312 = vst [vmem:[%s2103_s1 + $0x160] sm:$0xff] %v52_v44  ;;  %v55_v47 = vld [vmem:[%s2102_s0 + $0x178] sm:$0xff]  ;;  %313 = vst [vmem:[%s2103_s1 + $0x168] sm:$0xff] %v53_v45  ;;  %v56_v48 = vld [vmem:[%s2102_s0 + $0x180] sm:$0xff] }
  0x19   :  { %314 = vst [vmem:[%s2103_s1 + $0x170] sm:$0xff] %v54_v46  ;;  %315 = vst [vmem:[%s2103_s1 + $0x178] sm:$0xff] %v55_v47  ;;  %v57_v49 = vld [vmem:[%s2102_s0 + $0x188] sm:$0xff]  ;;  %v58_v50 = vld [vmem:[%s2102_s0 + $0x190] sm:$0xff] }
  0x1a   :  { %316 = vst [vmem:[%s2103_s1 + $0x180] sm:$0xff] %v56_v48  ;;  %317 = vst [vmem:[%s2103_s1 + $0x188] sm:$0xff] %v57_v49  ;;  %v59_v51 = vld [vmem:[%s2102_s0 + $0x198] sm:$0xff]  ;;  %v60_v52 = vld [vmem:[%s2102_s0 + $0x1a0] sm:$0xff] }
  0x1b   :  { %318 = vst [vmem:[%s2103_s1 + $0x190] sm:$0xff] %v58_v50  ;;  %v61_v53 = vld [vmem:[%s2102_s0 + $0x1a8] sm:$0xff]  ;;  %319 = vst [vmem:[%s2103_s1 + $0x198] sm:$0xff] %v59_v51  ;;  %v62_v54 = vld [vmem:[%s2102_s0 + $0x1b0] sm:$0xff] }
  0x1c   :  { %320 = vst [vmem:[%s2103_s1 + $0x1a0] sm:$0xff] %v60_v52  ;;  %321 = vst [vmem:[%s2103_s1 + $0x1a8] sm:$0xff] %v61_v53  ;;  %v63_v55 = vld [vmem:[%s2102_s0 + $0x1b8] sm:$0xff]  ;;  %v64_v56 = vld [vmem:[%s2102_s0 + $0x1c0] sm:$0xff] }
  0x1d   :  { %322 = vst [vmem:[%s2103_s1 + $0x1b0] sm:$0xff] %v62_v54  ;;  %323 = vst [vmem:[%s2103_s1 + $0x1b8] sm:$0xff] %v63_v55  ;;  %v65_v57 = vld [vmem:[%s2102_s0 + $0x1c8] sm:$0xff]  ;;  %v66_v58 = vld [vmem:[%s2102_s0 + $0x1d0] sm:$0xff] }
  0x1e   :  { %324 = vst [vmem:[%s2103_s1 + $0x1c0] sm:$0xff] %v64_v56  ;;  %v67_v59 = vld [vmem:[%s2102_s0 + $0x1d8] sm:$0xff]  ;;  %325 = vst [vmem:[%s2103_s1 + $0x1c8] sm:$0xff] %v65_v57  ;;  %v68_v60 = vld [vmem:[%s2102_s0 + $0x1e0] sm:$0xff] }
  0x1f   :  { %326 = vst [vmem:[%s2103_s1 + $0x1d0] sm:$0xff] %v66_v58  ;;  %327 = vst [vmem:[%s2103_s1 + $0x1d8] sm:$0xff] %v67_v59  ;;  %v69_v61 = vld [vmem:[%s2102_s0 + $0x1e8] sm:$0xff]  ;;  %v70_v62 = vld [vmem:[%s2102_s0 + $0x1f0] sm:$0xff] }
  0x20   :  { %328 = vst [vmem:[%s2103_s1 + $0x1e0] sm:$0xff] %v68_v60  ;;  %329 = vst [vmem:[%s2103_s1 + $0x1e8] sm:$0xff] %v69_v61  ;;  %v71_v63 = vld [vmem:[%s2102_s0 + $0x1f8] sm:$0xff]  ;;  %v72_v0 = vld [vmem:[%s2102_s0 + $0x200] sm:$0xff] }
  0x21   :  { %330 = vst [vmem:[%s2103_s1 + $0x1f0] sm:$0xff] %v70_v62  ;;  %v73_v1 = vld [vmem:[%s2102_s0 + $0x208] sm:$0xff]  ;;  %331 = vst [vmem:[%s2103_s1 + $0x1f8] sm:$0xff] %v71_v63  ;;  %v74_v2 = vld [vmem:[%s2102_s0 + $0x210] sm:$0xff] }
  0x22   :  { %332 = vst [vmem:[%s2103_s1 + $0x200] sm:$0xff] %v72_v0  ;;  %333 = vst [vmem:[%s2103_s1 + $0x208] sm:$0xff] %v73_v1  ;;  %v75_v3 = vld [vmem:[%s2102_s0 + $0x218] sm:$0xff]  ;;  %v76_v4 = vld [vmem:[%s2102_s0 + $0x220] sm:$0xff] }
  0x23   :  { %334 = vst [vmem:[%s2103_s1 + $0x210] sm:$0xff] %v74_v2  ;;  %335 = vst [vmem:[%s2103_s1 + $0x218] sm:$0xff] %v75_v3  ;;  %v77_v5 = vld [vmem:[%s2102_s0 + $0x228] sm:$0xff]  ;;  %v78_v6 = vld [vmem:[%s2102_s0 + $0x230] sm:$0xff] }
  0x24   :  { %336 = vst [vmem:[%s2103_s1 + $0x220] sm:$0xff] %v76_v4  ;;  %v79_v7 = vld [vmem:[%s2102_s0 + $0x238] sm:$0xff]  ;;  %337 = vst [vmem:[%s2103_s1 + $0x228] sm:$0xff] %v77_v5  ;;  %v80_v8 = vld [vmem:[%s2102_s0 + $0x240] sm:$0xff] }
  0x25   :  { %338 = vst [vmem:[%s2103_s1 + $0x230] sm:$0xff] %v78_v6  ;;  %339 = vst [vmem:[%s2103_s1 + $0x238] sm:$0xff] %v79_v7  ;;  %v81_v9 = vld [vmem:[%s2102_s0 + $0x248] sm:$0xff]  ;;  %v82_v10 = vld [vmem:[%s2102_s0 + $0x250] sm:$0xff] }
  0x26   :  { %340 = vst [vmem:[%s2103_s1 + $0x240] sm:$0xff] %v80_v8  ;;  %341 = vst [vmem:[%s2103_s1 + $0x248] sm:$0xff] %v81_v9  ;;  %v83_v11 = vld [vmem:[%s2102_s0 + $0x258] sm:$0xff]  ;;  %v84_v12 = vld [vmem:[%s2102_s0 + $0x260] sm:$0xff] }
  0x27   :  { %342 = vst [vmem:[%s2103_s1 + $0x250] sm:$0xff] %v82_v10  ;;  %v85_v13 = vld [vmem:[%s2102_s0 + $0x268] sm:$0xff]  ;;  %343 = vst [vmem:[%s2103_s1 + $0x258] sm:$0xff] %v83_v11  ;;  %v86_v14 = vld [vmem:[%s2102_s0 + $0x270] sm:$0xff] }
  0x28   :  { %344 = vst [vmem:[%s2103_s1 + $0x260] sm:$0xff] %v84_v12  ;;  %345 = vst [vmem:[%s2103_s1 + $0x268] sm:$0xff] %v85_v13  ;;  %v87_v15 = vld [vmem:[%s2102_s0 + $0x278] sm:$0xff]  ;;  %v88_v16 = vld [vmem:[%s2102_s0 + $0x280] sm:$0xff] }
  0x29   :  { %346 = vst [vmem:[%s2103_s1 + $0x270] sm:$0xff] %v86_v14  ;;  %347 = vst [vmem:[%s2103_s1 + $0x278] sm:$0xff] %v87_v15  ;;  %v89_v17 = vld [vmem:[%s2102_s0 + $0x288] sm:$0xff]  ;;  %v90_v18 = vld [vmem:[%s2102_s0 + $0x290] sm:$0xff] }
  0x2a   :  { %348 = vst [vmem:[%s2103_s1 + $0x280] sm:$0xff] %v88_v16  ;;  %v91_v19 = vld [vmem:[%s2102_s0 + $0x298] sm:$0xff]  ;;  %349 = vst [vmem:[%s2103_s1 + $0x288] sm:$0xff] %v89_v17  ;;  %v92_v20 = vld [vmem:[%s2102_s0 + $0x2a0] sm:$0xff] }
  0x2b   :  { %350 = vst [vmem:[%s2103_s1 + $0x290] sm:$0xff] %v90_v18  ;;  %351 = vst [vmem:[%s2103_s1 + $0x298] sm:$0xff] %v91_v19  ;;  %v93_v21 = vld [vmem:[%s2102_s0 + $0x2a8] sm:$0xff]  ;;  %v94_v22 = vld [vmem:[%s2102_s0 + $0x2b0] sm:$0xff] }
  0x2c   :  { %352 = vst [vmem:[%s2103_s1 + $0x2a0] sm:$0xff] %v92_v20  ;;  %353 = vst [vmem:[%s2103_s1 + $0x2a8] sm:$0xff] %v93_v21  ;;  %v95_v23 = vld [vmem:[%s2102_s0 + $0x2b8] sm:$0xff]  ;;  %v96_v24 = vld [vmem:[%s2102_s0 + $0x2c0] sm:$0xff] }
  0x2d   :  { %354 = vst [vmem:[%s2103_s1 + $0x2b0] sm:$0xff] %v94_v22  ;;  %v97_v25 = vld [vmem:[%s2102_s0 + $0x2c8] sm:$0xff]  ;;  %355 = vst [vmem:[%s2103_s1 + $0x2b8] sm:$0xff] %v95_v23  ;;  %v98_v26 = vld [vmem:[%s2102_s0 + $0x2d0] sm:$0xff] }
  0x2e   :  { %356 = vst [vmem:[%s2103_s1 + $0x2c0] sm:$0xff] %v96_v24  ;;  %357 = vst [vmem:[%s2103_s1 + $0x2c8] sm:$0xff] %v97_v25  ;;  %v99_v27 = vld [vmem:[%s2102_s0 + $0x2d8] sm:$0xff]  ;;  %v100_v28 = vld [vmem:[%s2102_s0 + $0x2e0] sm:$0xff] }
  0x2f   :  { %358 = vst [vmem:[%s2103_s1 + $0x2d0] sm:$0xff] %v98_v26  ;;  %359 = vst [vmem:[%s2103_s1 + $0x2d8] sm:$0xff] %v99_v27  ;;  %v101_v29 = vld [vmem:[%s2102_s0 + $0x2e8] sm:$0xff]  ;;  %v102_v30 = vld [vmem:[%s2102_s0 + $0x2f0] sm:$0xff] }
  0x30   :  { %360 = vst [vmem:[%s2103_s1 + $0x2e0] sm:$0xff] %v100_v28  ;;  %v103_v31 = vld [vmem:[%s2102_s0 + $0x2f8] sm:$0xff]  ;;  %361 = vst [vmem:[%s2103_s1 + $0x2e8] sm:$0xff] %v101_v29  ;;  %v104_v32 = vld [vmem:[%s2102_s0 + $0x300] sm:$0xff] }
  0x31   :  { %362 = vst [vmem:[%s2103_s1 + $0x2f0] sm:$0xff] %v102_v30  ;;  %363 = vst [vmem:[%s2103_s1 + $0x2f8] sm:$0xff] %v103_v31  ;;  %v105_v33 = vld [vmem:[%s2102_s0 + $0x308] sm:$0xff]  ;;  %v106_v34 = vld [vmem:[%s2102_s0 + $0x310] sm:$0xff] }
  0x32   :  { %364 = vst [vmem:[%s2103_s1 + $0x300] sm:$0xff] %v104_v32  ;;  %365 = vst [vmem:[%s2103_s1 + $0x308] sm:$0xff] %v105_v33  ;;  %v107_v35 = vld [vmem:[%s2102_s0 + $0x318] sm:$0xff]  ;;  %v108_v36 = vld [vmem:[%s2102_s0 + $0x320] sm:$0xff] }
  0x33   :  { %366 = vst [vmem:[%s2103_s1 + $0x310] sm:$0xff] %v106_v34  ;;  %v109_v37 = vld [vmem:[%s2102_s0 + $0x328] sm:$0xff]  ;;  %367 = vst [vmem:[%s2103_s1 + $0x318] sm:$0xff] %v107_v35  ;;  %v110_v38 = vld [vmem:[%s2102_s0 + $0x330] sm:$0xff] }
  0x34   :  { %368 = vst [vmem:[%s2103_s1 + $0x320] sm:$0xff] %v108_v36  ;;  %369 = vst [vmem:[%s2103_s1 + $0x328] sm:$0xff] %v109_v37  ;;  %v111_v39 = vld [vmem:[%s2102_s0 + $0x338] sm:$0xff]  ;;  %v112_v40 = vld [vmem:[%s2102_s0 + $0x340] sm:$0xff] }
  0x35   :  { %370 = vst [vmem:[%s2103_s1 + $0x330] sm:$0xff] %v110_v38  ;;  %371 = vst [vmem:[%s2103_s1 + $0x338] sm:$0xff] %v111_v39  ;;  %v113_v41 = vld [vmem:[%s2102_s0 + $0x348] sm:$0xff]  ;;  %v114_v42 = vld [vmem:[%s2102_s0 + $0x350] sm:$0xff] }
  0x36   :  { %372 = vst [vmem:[%s2103_s1 + $0x340] sm:$0xff] %v112_v40  ;;  %v115_v43 = vld [vmem:[%s2102_s0 + $0x358] sm:$0xff]  ;;  %373 = vst [vmem:[%s2103_s1 + $0x348] sm:$0xff] %v113_v41  ;;  %v116_v44 = vld [vmem:[%s2102_s0 + $0x360] sm:$0xff] }
  0x37   :  { %374 = vst [vmem:[%s2103_s1 + $0x350] sm:$0xff] %v114_v42  ;;  %375 = vst [vmem:[%s2103_s1 + $0x358] sm:$0xff] %v115_v43  ;;  %v117_v45 = vld [vmem:[%s2102_s0 + $0x368] sm:$0xff]  ;;  %v118_v46 = vld [vmem:[%s2102_s0 + $0x370] sm:$0xff] }
  0x38   :  { %376 = vst [vmem:[%s2103_s1 + $0x360] sm:$0xff] %v116_v44  ;;  %377 = vst [vmem:[%s2103_s1 + $0x368] sm:$0xff] %v117_v45  ;;  %v119_v47 = vld [vmem:[%s2102_s0 + $0x378] sm:$0xff]  ;;  %v120_v48 = vld [vmem:[%s2102_s0 + $0x380] sm:$0xff] }
  0x39   :  { %378 = vst [vmem:[%s2103_s1 + $0x370] sm:$0xff] %v118_v46  ;;  %v121_v49 = vld [vmem:[%s2102_s0 + $0x388] sm:$0xff]  ;;  %379 = vst [vmem:[%s2103_s1 + $0x378] sm:$0xff] %v119_v47  ;;  %v122_v50 = vld [vmem:[%s2102_s0 + $0x390] sm:$0xff] }
  0x3a   :  { %380 = vst [vmem:[%s2103_s1 + $0x380] sm:$0xff] %v120_v48  ;;  %381 = vst [vmem:[%s2103_s1 + $0x388] sm:$0xff] %v121_v49  ;;  %v123_v51 = vld [vmem:[%s2102_s0 + $0x398] sm:$0xff]  ;;  %v124_v52 = vld [vmem:[%s2102_s0 + $0x3a0] sm:$0xff] }
  0x3b   :  { %382 = vst [vmem:[%s2103_s1 + $0x390] sm:$0xff] %v122_v50  ;;  %383 = vst [vmem:[%s2103_s1 + $0x398] sm:$0xff] %v123_v51  ;;  %v125_v53 = vld [vmem:[%s2102_s0 + $0x3a8] sm:$0xff]  ;;  %v126_v54 = vld [vmem:[%s2102_s0 + $0x3b0] sm:$0xff] }
  0x3c   :  { %384 = vst [vmem:[%s2103_s1 + $0x3a0] sm:$0xff] %v124_v52  ;;  %v127_v55 = vld [vmem:[%s2102_s0 + $0x3b8] sm:$0xff]  ;;  %385 = vst [vmem:[%s2103_s1 + $0x3a8] sm:$0xff] %v125_v53  ;;  %v128_v56 = vld [vmem:[%s2102_s0 + $0x3c0] sm:$0xff] }
  0x3d   :  { %386 = vst [vmem:[%s2103_s1 + $0x3b0] sm:$0xff] %v126_v54  ;;  %387 = vst [vmem:[%s2103_s1 + $0x3b8] sm:$0xff] %v127_v55  ;;  %v129_v57 = vld [vmem:[%s2102_s0 + $0x3c8] sm:$0xff]  ;;  %v130_v58 = vld [vmem:[%s2102_s0 + $0x3d0] sm:$0xff] }
  0x3e   :  { %388 = vst [vmem:[%s2103_s1 + $0x3c0] sm:$0xff] %v128_v56  ;;  %389 = vst [vmem:[%s2103_s1 + $0x3c8] sm:$0xff] %v129_v57  ;;  %v131_v59 = vld [vmem:[%s2102_s0 + $0x3d8] sm:$0xff]  ;;  %v132_v60 = vld [vmem:[%s2102_s0 + $0x3e0] sm:$0xff] }
  0x3f   :  { %390 = vst [vmem:[%s2103_s1 + $0x3d0] sm:$0xff] %v130_v58  ;;  %v133_v61 = vld [vmem:[%s2102_s0 + $0x3e8] sm:$0xff]  ;;  %391 = vst [vmem:[%s2103_s1 + $0x3d8] sm:$0xff] %v131_v59  ;;  %v134_v62 = vld [vmem:[%s2102_s0 + $0x3f0] sm:$0xff] }
  0x40   :  { %392 = vst [vmem:[%s2103_s1 + $0x3e0] sm:$0xff] %v132_v60  ;;  %393 = vst [vmem:[%s2103_s1 + $0x3e8] sm:$0xff] %v133_v61  ;;  %v135_v63 = vld [vmem:[%s2102_s0 + $0x3f8] sm:$0xff]  ;;  %v136_v0 = vld [vmem:[%s2102_s0 + $0x400] sm:$0xff] }
  0x41   :  { %394 = vst [vmem:[%s2103_s1 + $0x3f0] sm:$0xff] %v134_v62  ;;  %395 = vst [vmem:[%s2103_s1 + $0x3f8] sm:$0xff] %v135_v63  ;;  %v137_v1 = vld [vmem:[%s2102_s0 + $0x408] sm:$0xff]  ;;  %v138_v2 = vld [vmem:[%s2102_s0 + $0x410] sm:$0xff] }
  0x42   :  { %396 = vst [vmem:[%s2103_s1 + $0x400] sm:$0xff] %v136_v0  ;;  %v139_v3 = vld [vmem:[%s2102_s0 + $0x418] sm:$0xff]  ;;  %397 = vst [vmem:[%s2103_s1 + $0x408] sm:$0xff] %v137_v1  ;;  %v140_v4 = vld [vmem:[%s2102_s0 + $0x420] sm:$0xff] }
  0x43   :  { %398 = vst [vmem:[%s2103_s1 + $0x410] sm:$0xff] %v138_v2  ;;  %399 = vst [vmem:[%s2103_s1 + $0x418] sm:$0xff] %v139_v3  ;;  %v141_v5 = vld [vmem:[%s2102_s0 + $0x428] sm:$0xff]  ;;  %v142_v6 = vld [vmem:[%s2102_s0 + $0x430] sm:$0xff] }
  0x44   :  { %400 = vst [vmem:[%s2103_s1 + $0x420] sm:$0xff] %v140_v4  ;;  %401 = vst [vmem:[%s2103_s1 + $0x428] sm:$0xff] %v141_v5  ;;  %v143_v7 = vld [vmem:[%s2102_s0 + $0x438] sm:$0xff]  ;;  %v144_v8 = vld [vmem:[%s2102_s0 + $0x440] sm:$0xff] }
  0x45   :  { %402 = vst [vmem:[%s2103_s1 + $0x430] sm:$0xff] %v142_v6  ;;  %v145_v9 = vld [vmem:[%s2102_s0 + $0x448] sm:$0xff]  ;;  %403 = vst [vmem:[%s2103_s1 + $0x438] sm:$0xff] %v143_v7  ;;  %v146_v10 = vld [vmem:[%s2102_s0 + $0x450] sm:$0xff] }
  0x46   :  { %404 = vst [vmem:[%s2103_s1 + $0x440] sm:$0xff] %v144_v8  ;;  %405 = vst [vmem:[%s2103_s1 + $0x448] sm:$0xff] %v145_v9  ;;  %v147_v11 = vld [vmem:[%s2102_s0 + $0x458] sm:$0xff]  ;;  %v148_v12 = vld [vmem:[%s2102_s0 + $0x460] sm:$0xff] }
  0x47   :  { %406 = vst [vmem:[%s2103_s1 + $0x450] sm:$0xff] %v146_v10  ;;  %407 = vst [vmem:[%s2103_s1 + $0x458] sm:$0xff] %v147_v11  ;;  %v149_v13 = vld [vmem:[%s2102_s0 + $0x468] sm:$0xff]  ;;  %v150_v14 = vld [vmem:[%s2102_s0 + $0x470] sm:$0xff] }
  0x48   :  { %408 = vst [vmem:[%s2103_s1 + $0x460] sm:$0xff] %v148_v12  ;;  %v151_v15 = vld [vmem:[%s2102_s0 + $0x478] sm:$0xff]  ;;  %409 = vst [vmem:[%s2103_s1 + $0x468] sm:$0xff] %v149_v13  ;;  %v152_v16 = vld [vmem:[%s2102_s0 + $0x480] sm:$0xff] }
  0x49   :  { %410 = vst [vmem:[%s2103_s1 + $0x470] sm:$0xff] %v150_v14  ;;  %411 = vst [vmem:[%s2103_s1 + $0x478] sm:$0xff] %v151_v15  ;;  %v153_v17 = vld [vmem:[%s2102_s0 + $0x488] sm:$0xff]  ;;  %v154_v18 = vld [vmem:[%s2102_s0 + $0x490] sm:$0xff] }
  0x4a   :  { %412 = vst [vmem:[%s2103_s1 + $0x480] sm:$0xff] %v152_v16  ;;  %413 = vst [vmem:[%s2103_s1 + $0x488] sm:$0xff] %v153_v17  ;;  %v155_v19 = vld [vmem:[%s2102_s0 + $0x498] sm:$0xff]  ;;  %v156_v20 = vld [vmem:[%s2102_s0 + $0x4a0] sm:$0xff] }
  0x4b   :  { %414 = vst [vmem:[%s2103_s1 + $0x490] sm:$0xff] %v154_v18  ;;  %v157_v21 = vld [vmem:[%s2102_s0 + $0x4a8] sm:$0xff]  ;;  %415 = vst [vmem:[%s2103_s1 + $0x498] sm:$0xff] %v155_v19  ;;  %v158_v22 = vld [vmem:[%s2102_s0 + $0x4b0] sm:$0xff] }
  0x4c   :  { %416 = vst [vmem:[%s2103_s1 + $0x4a0] sm:$0xff] %v156_v20  ;;  %417 = vst [vmem:[%s2103_s1 + $0x4a8] sm:$0xff] %v157_v21  ;;  %v159_v23 = vld [vmem:[%s2102_s0 + $0x4b8] sm:$0xff]  ;;  %v160_v24 = vld [vmem:[%s2102_s0 + $0x4c0] sm:$0xff] }
  0x4d   :  { %418 = vst [vmem:[%s2103_s1 + $0x4b0] sm:$0xff] %v158_v22  ;;  %419 = vst [vmem:[%s2103_s1 + $0x4b8] sm:$0xff] %v159_v23  ;;  %v161_v25 = vld [vmem:[%s2102_s0 + $0x4c8] sm:$0xff]  ;;  %v162_v26 = vld [vmem:[%s2102_s0 + $0x4d0] sm:$0xff] }
  0x4e   :  { %420 = vst [vmem:[%s2103_s1 + $0x4c0] sm:$0xff] %v160_v24  ;;  %v163_v27 = vld [vmem:[%s2102_s0 + $0x4d8] sm:$0xff]  ;;  %421 = vst [vmem:[%s2103_s1 + $0x4c8] sm:$0xff] %v161_v25  ;;  %v164_v28 = vld [vmem:[%s2102_s0 + $0x4e0] sm:$0xff] }
  0x4f   :  { %422 = vst [vmem:[%s2103_s1 + $0x4d0] sm:$0xff] %v162_v26  ;;  %423 = vst [vmem:[%s2103_s1 + $0x4d8] sm:$0xff] %v163_v27  ;;  %v165_v29 = vld [vmem:[%s2102_s0 + $0x4e8] sm:$0xff]  ;;  %v166_v30 = vld [vmem:[%s2102_s0 + $0x4f0] sm:$0xff] }
  0x50   :  { %424 = vst [vmem:[%s2103_s1 + $0x4e0] sm:$0xff] %v164_v28  ;;  %425 = vst [vmem:[%s2103_s1 + $0x4e8] sm:$0xff] %v165_v29  ;;  %v167_v31 = vld [vmem:[%s2102_s0 + $0x4f8] sm:$0xff]  ;;  %v168_v32 = vld [vmem:[%s2102_s0 + $0x500] sm:$0xff] }
  0x51   :  { %426 = vst [vmem:[%s2103_s1 + $0x4f0] sm:$0xff] %v166_v30  ;;  %v169_v33 = vld [vmem:[%s2102_s0 + $0x508] sm:$0xff]  ;;  %427 = vst [vmem:[%s2103_s1 + $0x4f8] sm:$0xff] %v167_v31  ;;  %v170_v34 = vld [vmem:[%s2102_s0 + $0x510] sm:$0xff] }
  0x52   :  { %428 = vst [vmem:[%s2103_s1 + $0x500] sm:$0xff] %v168_v32  ;;  %429 = vst [vmem:[%s2103_s1 + $0x508] sm:$0xff] %v169_v33  ;;  %v171_v35 = vld [vmem:[%s2102_s0 + $0x518] sm:$0xff]  ;;  %v172_v36 = vld [vmem:[%s2102_s0 + $0x520] sm:$0xff] }
  0x53   :  { %430 = vst [vmem:[%s2103_s1 + $0x510] sm:$0xff] %v170_v34  ;;  %431 = vst [vmem:[%s2103_s1 + $0x518] sm:$0xff] %v171_v35  ;;  %v173_v37 = vld [vmem:[%s2102_s0 + $0x528] sm:$0xff]  ;;  %v174_v38 = vld [vmem:[%s2102_s0 + $0x530] sm:$0xff] }
  0x54   :  { %432 = vst [vmem:[%s2103_s1 + $0x520] sm:$0xff] %v172_v36  ;;  %v175_v39 = vld [vmem:[%s2102_s0 + $0x538] sm:$0xff]  ;;  %433 = vst [vmem:[%s2103_s1 + $0x528] sm:$0xff] %v173_v37  ;;  %v176_v40 = vld [vmem:[%s2102_s0 + $0x540] sm:$0xff] }
  0x55   :  { %434 = vst [vmem:[%s2103_s1 + $0x530] sm:$0xff] %v174_v38  ;;  %435 = vst [vmem:[%s2103_s1 + $0x538] sm:$0xff] %v175_v39  ;;  %v177_v41 = vld [vmem:[%s2102_s0 + $0x548] sm:$0xff]  ;;  %v178_v42 = vld [vmem:[%s2102_s0 + $0x550] sm:$0xff] }
  0x56   :  { %436 = vst [vmem:[%s2103_s1 + $0x540] sm:$0xff] %v176_v40  ;;  %437 = vst [vmem:[%s2103_s1 + $0x548] sm:$0xff] %v177_v41  ;;  %v179_v43 = vld [vmem:[%s2102_s0 + $0x558] sm:$0xff]  ;;  %v180_v44 = vld [vmem:[%s2102_s0 + $0x560] sm:$0xff] }
  0x57   :  { %438 = vst [vmem:[%s2103_s1 + $0x550] sm:$0xff] %v178_v42  ;;  %v181_v45 = vld [vmem:[%s2102_s0 + $0x568] sm:$0xff]  ;;  %439 = vst [vmem:[%s2103_s1 + $0x558] sm:$0xff] %v179_v43  ;;  %v182_v46 = vld [vmem:[%s2102_s0 + $0x570] sm:$0xff] }
  0x58   :  { %440 = vst [vmem:[%s2103_s1 + $0x560] sm:$0xff] %v180_v44  ;;  %441 = vst [vmem:[%s2103_s1 + $0x568] sm:$0xff] %v181_v45  ;;  %v183_v47 = vld [vmem:[%s2102_s0 + $0x578] sm:$0xff]  ;;  %v184_v48 = vld [vmem:[%s2102_s0 + $0x580] sm:$0xff] }
  0x59   :  { %442 = vst [vmem:[%s2103_s1 + $0x570] sm:$0xff] %v182_v46  ;;  %443 = vst [vmem:[%s2103_s1 + $0x578] sm:$0xff] %v183_v47  ;;  %v185_v49 = vld [vmem:[%s2102_s0 + $0x588] sm:$0xff]  ;;  %v186_v50 = vld [vmem:[%s2102_s0 + $0x590] sm:$0xff] }
  0x5a   :  { %444 = vst [vmem:[%s2103_s1 + $0x580] sm:$0xff] %v184_v48  ;;  %v187_v51 = vld [vmem:[%s2102_s0 + $0x598] sm:$0xff]  ;;  %445 = vst [vmem:[%s2103_s1 + $0x588] sm:$0xff] %v185_v49  ;;  %v188_v52 = vld [vmem:[%s2102_s0 + $0x5a0] sm:$0xff] }
  0x5b   :  { %446 = vst [vmem:[%s2103_s1 + $0x590] sm:$0xff] %v186_v50  ;;  %447 = vst [vmem:[%s2103_s1 + $0x598] sm:$0xff] %v187_v51  ;;  %v189_v53 = vld [vmem:[%s2102_s0 + $0x5a8] sm:$0xff]  ;;  %v190_v54 = vld [vmem:[%s2102_s0 + $0x5b0] sm:$0xff] }
  0x5c   :  { %448 = vst [vmem:[%s2103_s1 + $0x5a0] sm:$0xff] %v188_v52  ;;  %449 = vst [vmem:[%s2103_s1 + $0x5a8] sm:$0xff] %v189_v53  ;;  %v191_v55 = vld [vmem:[%s2102_s0 + $0x5b8] sm:$0xff]  ;;  %v192_v56 = vld [vmem:[%s2102_s0 + $0x5c0] sm:$0xff] }
  0x5d   :  { %450 = vst [vmem:[%s2103_s1 + $0x5b0] sm:$0xff] %v190_v54  ;;  %v193_v57 = vld [vmem:[%s2102_s0 + $0x5c8] sm:$0xff]  ;;  %451 = vst [vmem:[%s2103_s1 + $0x5b8] sm:$0xff] %v191_v55  ;;  %v194_v58 = vld [vmem:[%s2102_s0 + $0x5d0] sm:$0xff] }
  0x5e   :  { %452 = vst [vmem:[%s2103_s1 + $0x5c0] sm:$0xff] %v192_v56  ;;  %453 = vst [vmem:[%s2103_s1 + $0x5c8] sm:$0xff] %v193_v57  ;;  %v195_v59 = vld [vmem:[%s2102_s0 + $0x5d8] sm:$0xff]  ;;  %v196_v60 = vld [vmem:[%s2102_s0 + $0x5e0] sm:$0xff] }
  0x5f   :  { %454 = vst [vmem:[%s2103_s1 + $0x5d0] sm:$0xff] %v194_v58  ;;  %455 = vst [vmem:[%s2103_s1 + $0x5d8] sm:$0xff] %v195_v59  ;;  %v197_v61 = vld [vmem:[%s2102_s0 + $0x5e8] sm:$0xff]  ;;  %v198_v62 = vld [vmem:[%s2102_s0 + $0x5f0] sm:$0xff] }
  0x60   :  { %456 = vst [vmem:[%s2103_s1 + $0x5e0] sm:$0xff] %v196_v60  ;;  %v199_v63 = vld [vmem:[%s2102_s0 + $0x5f8] sm:$0xff]  ;;  %457 = vst [vmem:[%s2103_s1 + $0x5e8] sm:$0xff] %v197_v61  ;;  %v200_v0 = vld [vmem:[%s2102_s0 + $0x600] sm:$0xff] }
  0x61   :  { %458 = vst [vmem:[%s2103_s1 + $0x5f0] sm:$0xff] %v198_v62  ;;  %459 = vst [vmem:[%s2103_s1 + $0x5f8] sm:$0xff] %v199_v63  ;;  %v201_v1 = vld [vmem:[%s2102_s0 + $0x608] sm:$0xff]  ;;  %v202_v2 = vld [vmem:[%s2102_s0 + $0x610] sm:$0xff] }
  0x62   :  { %460 = vst [vmem:[%s2103_s1 + $0x600] sm:$0xff] %v200_v0  ;;  %461 = vst [vmem:[%s2103_s1 + $0x608] sm:$0xff] %v201_v1  ;;  %v203_v3 = vld [vmem:[%s2102_s0 + $0x618] sm:$0xff]  ;;  %v204_v4 = vld [vmem:[%s2102_s0 + $0x620] sm:$0xff] }
  0x63   :  { %462 = vst [vmem:[%s2103_s1 + $0x610] sm:$0xff] %v202_v2  ;;  %v205_v5 = vld [vmem:[%s2102_s0 + $0x628] sm:$0xff]  ;;  %463 = vst [vmem:[%s2103_s1 + $0x618] sm:$0xff] %v203_v3  ;;  %v206_v6 = vld [vmem:[%s2102_s0 + $0x630] sm:$0xff] }
  0x64   :  { %464 = vst [vmem:[%s2103_s1 + $0x620] sm:$0xff] %v204_v4  ;;  %465 = vst [vmem:[%s2103_s1 + $0x628] sm:$0xff] %v205_v5  ;;  %v207_v7 = vld [vmem:[%s2102_s0 + $0x638] sm:$0xff]  ;;  %v208_v8 = vld [vmem:[%s2102_s0 + $0x640] sm:$0xff] }
  0x65   :  { %466 = vst [vmem:[%s2103_s1 + $0x630] sm:$0xff] %v206_v6  ;;  %467 = vst [vmem:[%s2103_s1 + $0x638] sm:$0xff] %v207_v7  ;;  %v209_v9 = vld [vmem:[%s2102_s0 + $0x648] sm:$0xff]  ;;  %v210_v10 = vld [vmem:[%s2102_s0 + $0x650] sm:$0xff] }
  0x66   :  { %468 = vst [vmem:[%s2103_s1 + $0x640] sm:$0xff] %v208_v8  ;;  %v211_v11 = vld [vmem:[%s2102_s0 + $0x658] sm:$0xff]  ;;  %469 = vst [vmem:[%s2103_s1 + $0x648] sm:$0xff] %v209_v9  ;;  %v212_v12 = vld [vmem:[%s2102_s0 + $0x660] sm:$0xff] }
  0x67   :  { %470 = vst [vmem:[%s2103_s1 + $0x650] sm:$0xff] %v210_v10  ;;  %471 = vst [vmem:[%s2103_s1 + $0x658] sm:$0xff] %v211_v11  ;;  %v213_v13 = vld [vmem:[%s2102_s0 + $0x668] sm:$0xff]  ;;  %v214_v14 = vld [vmem:[%s2102_s0 + $0x670] sm:$0xff] }
  0x68   :  { %472 = vst [vmem:[%s2103_s1 + $0x660] sm:$0xff] %v212_v12  ;;  %473 = vst [vmem:[%s2103_s1 + $0x668] sm:$0xff] %v213_v13  ;;  %v215_v15 = vld [vmem:[%s2102_s0 + $0x678] sm:$0xff]  ;;  %v216_v16 = vld [vmem:[%s2102_s0 + $0x680] sm:$0xff] }
  0x69   :  { %474 = vst [vmem:[%s2103_s1 + $0x670] sm:$0xff] %v214_v14  ;;  %v217_v17 = vld [vmem:[%s2102_s0 + $0x688] sm:$0xff]  ;;  %475 = vst [vmem:[%s2103_s1 + $0x678] sm:$0xff] %v215_v15  ;;  %v218_v18 = vld [vmem:[%s2102_s0 + $0x690] sm:$0xff] }
  0x6a   :  { %476 = vst [vmem:[%s2103_s1 + $0x680] sm:$0xff] %v216_v16  ;;  %477 = vst [vmem:[%s2103_s1 + $0x688] sm:$0xff] %v217_v17  ;;  %v219_v19 = vld [vmem:[%s2102_s0 + $0x698] sm:$0xff]  ;;  %v220_v20 = vld [vmem:[%s2102_s0 + $0x6a0] sm:$0xff] }
  0x6b   :  { %478 = vst [vmem:[%s2103_s1 + $0x690] sm:$0xff] %v218_v18  ;;  %479 = vst [vmem:[%s2103_s1 + $0x698] sm:$0xff] %v219_v19  ;;  %v221_v21 = vld [vmem:[%s2102_s0 + $0x6a8] sm:$0xff]  ;;  %v222_v22 = vld [vmem:[%s2102_s0 + $0x6b0] sm:$0xff] }
  0x6c   :  { %480 = vst [vmem:[%s2103_s1 + $0x6a0] sm:$0xff] %v220_v20  ;;  %v223_v23 = vld [vmem:[%s2102_s0 + $0x6b8] sm:$0xff]  ;;  %481 = vst [vmem:[%s2103_s1 + $0x6a8] sm:$0xff] %v221_v21  ;;  %v224_v24 = vld [vmem:[%s2102_s0 + $0x6c0] sm:$0xff] }
  0x6d   :  { %482 = vst [vmem:[%s2103_s1 + $0x6b0] sm:$0xff] %v222_v22  ;;  %483 = vst [vmem:[%s2103_s1 + $0x6b8] sm:$0xff] %v223_v23  ;;  %v225_v25 = vld [vmem:[%s2102_s0 + $0x6c8] sm:$0xff]  ;;  %v226_v26 = vld [vmem:[%s2102_s0 + $0x6d0] sm:$0xff] }
  0x6e   :  { %484 = vst [vmem:[%s2103_s1 + $0x6c0] sm:$0xff] %v224_v24  ;;  %485 = vst [vmem:[%s2103_s1 + $0x6c8] sm:$0xff] %v225_v25  ;;  %v227_v27 = vld [vmem:[%s2102_s0 + $0x6d8] sm:$0xff]  ;;  %v228_v28 = vld [vmem:[%s2102_s0 + $0x6e0] sm:$0xff] }
  0x6f   :  { %486 = vst [vmem:[%s2103_s1 + $0x6d0] sm:$0xff] %v226_v26  ;;  %v229_v29 = vld [vmem:[%s2102_s0 + $0x6e8] sm:$0xff]  ;;  %487 = vst [vmem:[%s2103_s1 + $0x6d8] sm:$0xff] %v227_v27  ;;  %v230_v30 = vld [vmem:[%s2102_s0 + $0x6f0] sm:$0xff] }
  0x70   :  { %488 = vst [vmem:[%s2103_s1 + $0x6e0] sm:$0xff] %v228_v28  ;;  %489 = vst [vmem:[%s2103_s1 + $0x6e8] sm:$0xff] %v229_v29  ;;  %v231_v31 = vld [vmem:[%s2102_s0 + $0x6f8] sm:$0xff]  ;;  %v232_v32 = vld [vmem:[%s2102_s0 + $0x700] sm:$0xff] }
  0x71   :  { %490 = vst [vmem:[%s2103_s1 + $0x6f0] sm:$0xff] %v230_v30  ;;  %491 = vst [vmem:[%s2103_s1 + $0x6f8] sm:$0xff] %v231_v31  ;;  %v233_v33 = vld [vmem:[%s2102_s0 + $0x708] sm:$0xff]  ;;  %v234_v34 = vld [vmem:[%s2102_s0 + $0x710] sm:$0xff] }
  0x72   :  { %492 = vst [vmem:[%s2103_s1 + $0x700] sm:$0xff] %v232_v32  ;;  %v235_v35 = vld [vmem:[%s2102_s0 + $0x718] sm:$0xff]  ;;  %493 = vst [vmem:[%s2103_s1 + $0x708] sm:$0xff] %v233_v33  ;;  %v236_v36 = vld [vmem:[%s2102_s0 + $0x720] sm:$0xff] }
  0x73   :  { %494 = vst [vmem:[%s2103_s1 + $0x710] sm:$0xff] %v234_v34  ;;  %495 = vst [vmem:[%s2103_s1 + $0x718] sm:$0xff] %v235_v35  ;;  %v237_v37 = vld [vmem:[%s2102_s0 + $0x728] sm:$0xff]  ;;  %v238_v38 = vld [vmem:[%s2102_s0 + $0x730] sm:$0xff] }
  0x74   :  { %496 = vst [vmem:[%s2103_s1 + $0x720] sm:$0xff] %v236_v36  ;;  %497 = vst [vmem:[%s2103_s1 + $0x728] sm:$0xff] %v237_v37  ;;  %v239_v39 = vld [vmem:[%s2102_s0 + $0x738] sm:$0xff]  ;;  %v240_v40 = vld [vmem:[%s2102_s0 + $0x740] sm:$0xff] }
  0x75   :  { %498 = vst [vmem:[%s2103_s1 + $0x730] sm:$0xff] %v238_v38  ;;  %v241_v41 = vld [vmem:[%s2102_s0 + $0x748] sm:$0xff]  ;;  %499 = vst [vmem:[%s2103_s1 + $0x738] sm:$0xff] %v239_v39  ;;  %v242_v42 = vld [vmem:[%s2102_s0 + $0x750] sm:$0xff] }
  0x76   :  { %500 = vst [vmem:[%s2103_s1 + $0x740] sm:$0xff] %v240_v40  ;;  %501 = vst [vmem:[%s2103_s1 + $0x748] sm:$0xff] %v241_v41  ;;  %v243_v43 = vld [vmem:[%s2102_s0 + $0x758] sm:$0xff]  ;;  %v244_v44 = vld [vmem:[%s2102_s0 + $0x760] sm:$0xff] }
  0x77   :  { %502 = vst [vmem:[%s2103_s1 + $0x750] sm:$0xff] %v242_v42  ;;  %503 = vst [vmem:[%s2103_s1 + $0x758] sm:$0xff] %v243_v43  ;;  %v245_v45 = vld [vmem:[%s2102_s0 + $0x768] sm:$0xff]  ;;  %v246_v46 = vld [vmem:[%s2102_s0 + $0x770] sm:$0xff] }
  0x78   :  { %504 = vst [vmem:[%s2103_s1 + $0x760] sm:$0xff] %v244_v44  ;;  %v247_v47 = vld [vmem:[%s2102_s0 + $0x778] sm:$0xff]  ;;  %505 = vst [vmem:[%s2103_s1 + $0x768] sm:$0xff] %v245_v45  ;;  %v248_v48 = vld [vmem:[%s2102_s0 + $0x780] sm:$0xff] }
  0x79   :  { %506 = vst [vmem:[%s2103_s1 + $0x770] sm:$0xff] %v246_v46  ;;  %507 = vst [vmem:[%s2103_s1 + $0x778] sm:$0xff] %v247_v47  ;;  %v249_v49 = vld [vmem:[%s2102_s0 + $0x788] sm:$0xff]  ;;  %v250_v50 = vld [vmem:[%s2102_s0 + $0x790] sm:$0xff] }
  0x7a   :  { %508 = vst [vmem:[%s2103_s1 + $0x780] sm:$0xff] %v248_v48  ;;  %509 = vst [vmem:[%s2103_s1 + $0x788] sm:$0xff] %v249_v49  ;;  %v251_v51 = vld [vmem:[%s2102_s0 + $0x798] sm:$0xff]  ;;  %v252_v52 = vld [vmem:[%s2102_s0 + $0x7a0] sm:$0xff] }
  0x7b   :  { %510 = vst [vmem:[%s2103_s1 + $0x790] sm:$0xff] %v250_v50  ;;  %v253_v53 = vld [vmem:[%s2102_s0 + $0x7a8] sm:$0xff]  ;;  %511 = vst [vmem:[%s2103_s1 + $0x798] sm:$0xff] %v251_v51  ;;  %v254_v54 = vld [vmem:[%s2102_s0 + $0x7b0] sm:$0xff] }
  0x7c   :  { %512 = vst [vmem:[%s2103_s1 + $0x7a0] sm:$0xff] %v252_v52  ;;  %513 = vst [vmem:[%s2103_s1 + $0x7a8] sm:$0xff] %v253_v53  ;;  %v255_v55 = vld [vmem:[%s2102_s0 + $0x7b8] sm:$0xff]  ;;  %v256_v56 = vld [vmem:[%s2102_s0 + $0x7c0] sm:$0xff] }
  0x7d   :  { %514 = vst [vmem:[%s2103_s1 + $0x7b0] sm:$0xff] %v254_v54  ;;  %515 = vst [vmem:[%s2103_s1 + $0x7b8] sm:$0xff] %v255_v55  ;;  %v257_v57 = vld [vmem:[%s2102_s0 + $0x7c8] sm:$0xff]  ;;  %v258_v58 = vld [vmem:[%s2102_s0 + $0x7d0] sm:$0xff] }
  0x7e   :  { %516 = vst [vmem:[%s2103_s1 + $0x7c0] sm:$0xff] %v256_v56  ;;  %v259_v59 = vld [vmem:[%s2102_s0 + $0x7d8] sm:$0xff]  ;;  %517 = vst [vmem:[%s2103_s1 + $0x7c8] sm:$0xff] %v257_v57  ;;  %v260_v60 = vld [vmem:[%s2102_s0 + $0x7e0] sm:$0xff] }
  0x7f   :  { %518 = vst [vmem:[%s2103_s1 + $0x7d0] sm:$0xff] %v258_v58  ;;  %519 = vst [vmem:[%s2103_s1 + $0x7d8] sm:$0xff] %v259_v59  ;;  %v261_v61 = vld [vmem:[%s2102_s0 + $0x7e8] sm:$0xff]  ;;  %v262_v62 = vld [vmem:[%s2102_s0 + $0x7f0] sm:$0xff] }
  0x80   :  { %520 = vst [vmem:[%s2103_s1 + $0x7e0] sm:$0xff] %v260_v60  ;;  %521 = vst [vmem:[%s2103_s1 + $0x7e8] sm:$0xff] %v261_v61  ;;  %v263_v63 = vld [vmem:[%s2102_s0 + $0x7f8] sm:$0xff]  ;;  %v264_v0 = vld [vmem:[%s2102_s0 + $0x800] sm:$0xff] }
  0x81   :  { %522 = vst [vmem:[%s2103_s1 + $0x7f0] sm:$0xff] %v262_v62  ;;  %v265_v1 = vld [vmem:[%s2102_s0 + $0x808] sm:$0xff]  ;;  %523 = vst [vmem:[%s2103_s1 + $0x7f8] sm:$0xff] %v263_v63  ;;  %v266_v2 = vld [vmem:[%s2102_s0 + $0x810] sm:$0xff] }
  0x82   :  { %524 = vst [vmem:[%s2103_s1 + $0x800] sm:$0xff] %v264_v0  ;;  %525 = vst [vmem:[%s2103_s1 + $0x808] sm:$0xff] %v265_v1  ;;  %v267_v3 = vld [vmem:[%s2102_s0 + $0x818] sm:$0x1] }
  0x83   :  { %526 = vst [vmem:[%s2103_s1 + $0x810] sm:$0xff] %v266_v2  ;;  %527 = vst [vmem:[%s2103_s1 + $0x818] sm:$0x1] %v267_v3 }

</bundles_post_ra>
